<compile_context>
chip_gen: v6e
topology: v6e:2x2x1
jax: 0.10.0
libtpu: 0.0.40
codegen_flags: <defaults>
</compile_context>

<pallas_src>
import functools

import jax
import jax.numpy as jnp
from jax import lax
from jax.experimental import pallas as pl
from jax.experimental.pallas import tpu as pltpu


# ---------------------------------------------------------------------------
# helpers
# ---------------------------------------------------------------------------
def _round_up(x, m):
    return (x + m - 1) // m * m


def _cdiv(a, b):
    return -(-a // b)


def _vmem_caps():
    """Generation-aware (VMEM-budget, vmem_limit) in bytes."""
    cap = 64 << 20                      # conservative default (v7x per-core VMEM)
    try:
        info = pltpu.get_tpu_info()
        cap = int(getattr(info, "vmem_capacity_bytes", cap)) or cap
    except Exception:
        pass
    budget = max(8 << 20, min(cap // 4, 48 << 20))   # 16 MiB on v7x, 32 MiB on v5e/v6e
    limit = max(32 << 20, min(cap // 2, 96 << 20))   # 32 MiB on v7x, 64 MiB on v5e/v6e
    return budget, limit


def _pick_tile(lp_img, cin, cout, halo, op_bytes, out_bytes, budget, max_tile_lanes):
    """Choose the slab tile TM (multiple of 128) and derived padded widths."""
    halo_pad = _round_up(max(halo, 1), 128)
    # Conservative bytes per slab column held live in the pipeline:
    #   2 input blocks (cur + next) double-buffered + output block double-buffered
    #   + halo-assembly scratch + f32 accumulator values.
    per_col = (2 * 2 * cin * op_bytes
               + 2 * cout * out_bytes
               + cin * op_bytes
               + cout * 4)
    tm_cap = max(128, (budget // per_col) // 128 * 128)
    if max_tile_lanes is not None:
        tm_cap = max(128, min(tm_cap, max_tile_lanes // 128 * 128))

    tm_single = _round_up(lp_img, 128)
    if tm_single <= tm_cap:
        # Whole per-image slab in one block; input block also carries the halo.
        x_width = _round_up(tm_single + halo, 128)
        return dict(single=True, tm=tm_single, mt=1, x_width=x_width,
                    halo_pad=halo_pad)

    tm = max(tm_cap, halo_pad)          # tiled path requires TM >= halo
    mt = _cdiv(lp_img, tm)
    return dict(single=False, tm=tm, mt=mt, x_width=mt * tm, halo_pad=halo_pad)


# ---------------------------------------------------------------------------
# kernels
# ---------------------------------------------------------------------------
def _conv_slab_kernel(x_ref, w_ref, o_ref, *, tap_offs, tm):
    """Single-tile variant: the x block already holds TM + halo slab columns.

    x_ref : (1, Cin, x_width)       operand-dtype padded flat image
    w_ref : (KH*KW, Cout, Cin)      pre-binarized, bias-added, nmk-scaled weights
    o_ref : (1, Cout, TM)           output slab tile (lane-dense)
    """
    acc = None
    for t, off in enumerate(tap_offs):                    # static unroll (KH*KW)
        xs = x_ref[0, :, off:off + tm]                    # (Cin, TM)
        contrib = jnp.dot(w_ref[t], xs, preferred_element_type=jnp.float32)
        acc = contrib if acc is None else acc + contrib
    o_ref[0] = acc.astype(o_ref.dtype)


def _conv_slab_kernel_halo(x_cur_ref, x_nxt_ref, w_ref, o_ref, xbuf,
                           *, tap_offs, tm, halo_pad):
    """Tiled variant: current tile + halo columns of the next tile in VMEM.

    x_cur_ref / x_nxt_ref : (1, Cin, TM)
    xbuf                  : (Cin, TM + halo_pad) VMEM scratch
    """
    xbuf[:, :tm] = x_cur_ref[0]
    xbuf[:, tm:] = x_nxt_ref[0, :, :halo_pad]
    acc = None
    for t, off in enumerate(tap_offs):                    # static unroll (KH*KW)
        xs = xbuf[:, off:off + tm]                        # (Cin, TM)
        contrib = jnp.dot(w_ref[t], xs, preferred_element_type=jnp.float32)
        acc = contrib if acc is None else acc + contrib
    o_ref[0] = acc.astype(o_ref.dtype)


# ---------------------------------------------------------------------------
# wrapper
# ---------------------------------------------------------------------------
def binary_conv2d(x_nchw, weight_oihw, nmk, kk, ker_bias=None, *,
                  stride=1, padding=1,
                  out_dtype=jnp.float32, operand_dtype=jnp.bfloat16,
                  max_tile_lanes=None):
    """Pallas implementation of BinaryConv2D.forward.

    x_nchw      : (N, Cin, H, W) float32
    weight_oihw : (Cout, Cin, KH, KW) float32 raw weights
    nmk, kk     : shape-(1,) float32 module parameters (fully traced; no host read)
    ker_bias    : None or (Cout, 1, 1, 1) float32
    out_dtype   : output dtype (float32 default; bfloat16 halves output HBM bytes)
    operand_dtype : MXU operand dtype (bfloat16 default; float32 for exact fallback)
    max_tile_lanes: optional cap on the slab tile width (mainly for testing)
    returns     : (N, Cout, Ho, Wo) out_dtype
    """
    N, Cin, H, W = x_nchw.shape
    OC, _, KH, KW = weight_oihw.shape
    s = int(stride)
    Ho = (H + 2 * padding - KH) // s + 1
    Wo = (W + 2 * padding - KW) // s + 1
    Hp, Wp = H + 2 * padding, W + 2 * padding
    Lp = Hp * Wp
    halo = (KH - 1) * Wp + (KW - 1)
    tap_offs = [kh * Wp + kw for kh in range(KH) for kw in range(KW)]

    # ---- weights: binarize + bias + fold nmk, outside the kernel (tiny) ----
    kk_s = jnp.reshape(jnp.asarray(kk, jnp.float32), ())
    nmk_s = jnp.reshape(jnp.asarray(nmk, jnp.float32), ())
    w = jnp.asarray(weight_oihw, jnp.float32)
    w_bin = jnp.where(kk_s < 1000000.0, jnp.tanh(w * kk_s), jnp.sign(w))
    if ker_bias is not None:
        w_bin = w_bin + jnp.reshape(jnp.asarray(ker_bias, jnp.float32), (OC, 1, 1, 1))
    # Conv is linear in the weights, so folding nmk in here is exact.
    w_eff = nmk_s * w_bin                                     # (OC, Cin, KH, KW)
    w_taps = (jnp.transpose(w_eff, (2, 3, 0, 1))
              .reshape(KH * KW, OC, Cin).astype(operand_dtype))

    # ---- tiling plan (generation-aware VMEM budget) ----
    budget, vmem_limit = _vmem_caps()
    op_b = jnp.dtype(operand_dtype).itemsize
    out_b = jnp.dtype(out_dtype).itemsize
    plan = _pick_tile(Lp, Cin, OC, halo, op_b, out_b, budget, max_tile_lanes)
    TM, MT = plan["tm"], plan["mt"]
    M_out = TM * MT

    # ---- input: spatial zero-pad, flatten per image, pad lane axis ----
    x_pad = jnp.pad(x_nchw.astype(operand_dtype),
                    ((0, 0), (0, 0), (padding, padding), (padding, padding)))
    x_flat = x_pad.reshape(N, Cin, Lp)                        # contiguous reshape
    x_flat = jnp.pad(x_flat, ((0, 0), (0, 0), (0, plan["x_width"] - Lp)))

    w_spec = pl.BlockSpec((KH * KW, OC, Cin), lambda n, t: (0, 0, 0),
                          pipeline_mode=pl.Buffered(1))       # grid-invariant, tiny
    out_spec = pl.BlockSpec((1, OC, TM), lambda n, t: (n, 0, t))
    out_shape = jax.ShapeDtypeStruct((N, OC, M_out), out_dtype)

    if plan["single"]:
        kernel = functools.partial(_conv_slab_kernel, tap_offs=tap_offs, tm=TM)
        in_specs = [pl.BlockSpec((1, Cin, plan["x_width"]), lambda n, t: (n, 0, 0)),
                    w_spec]
        scratch_shapes = []
        args = (x_flat, w_taps)
    else:
        halo_pad = plan["halo_pad"]
        last = MT - 1
        kernel = functools.partial(_conv_slab_kernel_halo, tap_offs=tap_offs,
                                   tm=TM, halo_pad=halo_pad)
        in_specs = [
            pl.BlockSpec((1, Cin, TM), lambda n, t: (n, 0, t)),
            # Neighbouring tile for the halo; clamped on the last tile (the
            # clamped data only feeds output columns that are sliced away).
            pl.BlockSpec((1, Cin, TM),
                         lambda n, t: (n, 0, jnp.minimum(t + 1, last))),
            w_spec,
        ]
        scratch_shapes = [pltpu.VMEM((Cin, TM + halo_pad), operand_dtype)]
        args = (x_flat, x_flat, w_taps)

    out = pl.pallas_call(
        kernel,
        out_shape=out_shape,
        grid_spec=pltpu.PrefetchScalarGridSpec(
            num_scalar_prefetch=0,
            grid=(N, MT),
            in_specs=in_specs,
            out_specs=out_spec,
            scratch_shapes=scratch_shapes),
        compiler_params=pltpu.CompilerParams(
            dimension_semantics=("parallel", "parallel"),
            vmem_limit_bytes=int(vmem_limit)),
    )(*args)

    # slab -> NCHW: drop pad columns (contiguous slice + reshape, no transpose),
    # then the strided spatial crop.
    out = out[:, :, :Lp].reshape(N, OC, Hp, Wp)
    out = out[:, :, ::s, ::s][:, :, :Ho, :Wo]
    return out


# ---------------------------------------------------------------------------
# pure-JAX reference (mirrors the PyTorch forward)
# ---------------------------------------------------------------------------
def _reference(x_nchw, weight_oihw, nmk, kk, ker_bias=None, *, stride=1, padding=1):
    kk_s = jnp.reshape(jnp.asarray(kk, jnp.float32), ())
    nmk_s = jnp.reshape(jnp.asarray(nmk, jnp.float32), ())
    w = jnp.where(kk_s < 1000000.0, jnp.tanh(weight_oihw * kk_s),
                  jnp.sign(weight_oihw))
    if ker_bias is not None:
        w = w + ker_bias
    out = lax.conv_general_dilated(
        x_nchw, w, window_strides=(stride, stride),
        padding=[(padding, padding), (padding, padding)],
        dimension_numbers=("NCHW", "OIHW", "NCHW"))
    return nmk_s * out


if __name__ == "__main__":
    # Module config: BinaryConv2D(in_channel=4, out_channel=8, ker_size=3,
    #                             num_stride=1, padding=1, ker_bias=False)
    key = jax.random.PRNGKey(0)
    k1, k2, k3 = jax.random.split(key, 3)

    N, Cin, H, W = 2, 4, 16, 16
    Cout, K = 8, 3

    x = jax.random.normal(k1, (N, Cin, H, W), dtype=jnp.float32)
    weight = jax.random.uniform(k2, (Cout, Cin, K, K),
                                minval=-0.1, maxval=0.1, dtype=jnp.float32)
    nmk = jnp.array([1.0], jnp.float32)   # nn.Parameter([1.0])
    kk = jnp.array([1.0], jnp.float32)    # buffer (tanh branch)
    ker_bias = None                        # ker_bias=False branch

    out = binary_conv2d(x, weight, nmk, kk, ker_bias, stride=1, padding=1)
    out = jax.block_until_ready(out)
    ref = _reference(x, weight, nmk, kk, ker_bias, stride=1, padding=1)
    assert out.shape == (N, Cout, H, W), out.shape
    # bf16 MXU operands with f32 accumulation vs f32 reference.
    assert jnp.allclose(out, ref, atol=5e-2, rtol=5e-2), (
        float(jnp.max(jnp.abs(out - ref))))

    # Exercise the tiled (halo) path with a forced-small slab tile.
    N2, H2, W2 = 2, 32, 32
    x2 = jax.random.normal(k3, (N2, Cin, H2, W2), dtype=jnp.float32)
    out2 = binary_conv2d(x2, weight, nmk, kk, ker_bias, stride=1, padding=1,
                         max_tile_lanes=256)
    out2 = jax.block_until_ready(out2)
    ref2 = _reference(x2, weight, nmk, kk, ker_bias, stride=1, padding=1)
    assert out2.shape == (N2, Cout, H2, W2), out2.shape
    assert jnp.allclose(out2, ref2, atol=5e-2, rtol=5e-2), (
        float(jnp.max(jnp.abs(out2 - ref2))))

    print("KERNEL_OK")
</pallas_src>

<mosaic_0001>
module attributes {stable_mosaic.version = 11 : i64} {
  func.func @_conv_slab_kernel(%arg0: i32, %arg1: i32, %arg2: memref<1x4x512xbf16, #tpu.memory_space<vmem>>, %arg3: memref<9x8x4xbf16, #tpu.memory_space<vmem>>, %arg4: memref<1x8x384xf32, #tpu.memory_space<vmem>>) attributes {dimension_semantics = [#tpu.dimension_semantics<parallel>, #tpu.dimension_semantics<parallel>], iteration_bounds = array<i64: 2, 1>, scalar_prefetch = 0 : i64, scratch_operands = 0 : i64, tpu.core_type = #tpu.core_type<tc>, window_params = [{transform_indices = @transform_0, window_bounds = array<i64: 1, 4, 512>}, {pipeline_mode = #tpu.pipeline_mode<synchronous>, transform_indices = @transform_1, window_bounds = array<i64: 9, 8, 4>}, {transform_indices = @transform_2, window_bounds = array<i64: 1, 8, 384>}]} {
    %c0 = arith.constant 0 : index
    %c0_0 = arith.constant 0 : index
    %c0_1 = arith.constant 0 : index
    %0 = vector.load %arg2[%c0, %c0_0, %c0_1] : memref<1x4x512xbf16, #tpu.memory_space<vmem>>, vector<1x4x384xbf16>
    %1 = vector.shape_cast %0 : vector<1x4x384xbf16> to vector<4x384xbf16>
    %c0_2 = arith.constant 0 : index
    %c0_3 = arith.constant 0 : index
    %c0_4 = arith.constant 0 : index
    %2 = vector.load %arg3[%c0_2, %c0_3, %c0_4] : memref<9x8x4xbf16, #tpu.memory_space<vmem>>, vector<1x8x4xbf16>
    %3 = vector.shape_cast %2 : vector<1x8x4xbf16> to vector<8x4xbf16>
    %cst = arith.constant dense<0.000000e+00> : vector<8x384xf32>
    %4 = tpu.matmul %3, %1, %cst {dimension_numbers = #tpu.dot_dimension_numbers<[1], [0], [0], [1], [0, 0, 1, 1], [], []>} : vector<8x4xbf16>, vector<4x384xbf16>, vector<8x384xf32> -> vector<8x384xf32>
    %c0_5 = arith.constant 0 : index
    %c0_6 = arith.constant 0 : index
    %c1 = arith.constant 1 : index
    %5 = vector.load %arg2[%c0_5, %c0_6, %c1] : memref<1x4x512xbf16, #tpu.memory_space<vmem>>, vector<1x4x384xbf16>
    %6 = vector.shape_cast %5 : vector<1x4x384xbf16> to vector<4x384xbf16>
    %c1_7 = arith.constant 1 : index
    %c0_8 = arith.constant 0 : index
    %c0_9 = arith.constant 0 : index
    %7 = vector.load %arg3[%c1_7, %c0_8, %c0_9] : memref<9x8x4xbf16, #tpu.memory_space<vmem>>, vector<1x8x4xbf16>
    %8 = vector.shape_cast %7 : vector<1x8x4xbf16> to vector<8x4xbf16>
    %cst_10 = arith.constant dense<0.000000e+00> : vector<8x384xf32>
    %9 = tpu.matmul %8, %6, %cst_10 {dimension_numbers = #tpu.dot_dimension_numbers<[1], [0], [0], [1], [0, 0, 1, 1], [], []>} : vector<8x4xbf16>, vector<4x384xbf16>, vector<8x384xf32> -> vector<8x384xf32>
    %10 = arith.addf %4, %9 : vector<8x384xf32>
    %c0_11 = arith.constant 0 : index
    %c0_12 = arith.constant 0 : index
    %c2 = arith.constant 2 : index
    %11 = vector.load %arg2[%c0_11, %c0_12, %c2] : memref<1x4x512xbf16, #tpu.memory_space<vmem>>, vector<1x4x384xbf16>
    %12 = vector.shape_cast %11 : vector<1x4x384xbf16> to vector<4x384xbf16>
    %c2_13 = arith.constant 2 : index
    %c0_14 = arith.constant 0 : index
    %c0_15 = arith.constant 0 : index
    %13 = vector.load %arg3[%c2_13, %c0_14, %c0_15] : memref<9x8x4xbf16, #tpu.memory_space<vmem>>, vector<1x8x4xbf16>
    %14 = vector.shape_cast %13 : vector<1x8x4xbf16> to vector<8x4xbf16>
    %cst_16 = arith.constant dense<0.000000e+00> : vector<8x384xf32>
    %15 = tpu.matmul %14, %12, %cst_16 {dimension_numbers = #tpu.dot_dimension_numbers<[1], [0], [0], [1], [0, 0, 1, 1], [], []>} : vector<8x4xbf16>, vector<4x384xbf16>, vector<8x384xf32> -> vector<8x384xf32>
    %16 = arith.addf %10, %15 : vector<8x384xf32>
    %c0_17 = arith.constant 0 : index
    %c0_18 = arith.constant 0 : index
    %c18 = arith.constant 18 : index
    %17 = vector.load %arg2[%c0_17, %c0_18, %c18] : memref<1x4x512xbf16, #tpu.memory_space<vmem>>, vector<1x4x384xbf16>
    %18 = vector.shape_cast %17 : vector<1x4x384xbf16> to vector<4x384xbf16>
    %c3 = arith.constant 3 : index
    %c0_19 = arith.constant 0 : index
    %c0_20 = arith.constant 0 : index
    %19 = vector.load %arg3[%c3, %c0_19, %c0_20] : memref<9x8x4xbf16, #tpu.memory_space<vmem>>, vector<1x8x4xbf16>
    %20 = vector.shape_cast %19 : vector<1x8x4xbf16> to vector<8x4xbf16>
    %cst_21 = arith.constant dense<0.000000e+00> : vector<8x384xf32>
    %21 = tpu.matmul %20, %18, %cst_21 {dimension_numbers = #tpu.dot_dimension_numbers<[1], [0], [0], [1], [0, 0, 1, 1], [], []>} : vector<8x4xbf16>, vector<4x384xbf16>, vector<8x384xf32> -> vector<8x384xf32>
    %22 = arith.addf %16, %21 : vector<8x384xf32>
    %c0_22 = arith.constant 0 : index
    %c0_23 = arith.constant 0 : index
    %c19 = arith.constant 19 : index
    %23 = vector.load %arg2[%c0_22, %c0_23, %c19] : memref<1x4x512xbf16, #tpu.memory_space<vmem>>, vector<1x4x384xbf16>
    %24 = vector.shape_cast %23 : vector<1x4x384xbf16> to vector<4x384xbf16>
    %c4 = arith.constant 4 : index
    %c0_24 = arith.constant 0 : index
    %c0_25 = arith.constant 0 : index
    %25 = vector.load %arg3[%c4, %c0_24, %c0_25] : memref<9x8x4xbf16, #tpu.memory_space<vmem>>, vector<1x8x4xbf16>
    %26 = vector.shape_cast %25 : vector<1x8x4xbf16> to vector<8x4xbf16>
    %cst_26 = arith.constant dense<0.000000e+00> : vector<8x384xf32>
    %27 = tpu.matmul %26, %24, %cst_26 {dimension_numbers = #tpu.dot_dimension_numbers<[1], [0], [0], [1], [0, 0, 1, 1], [], []>} : vector<8x4xbf16>, vector<4x384xbf16>, vector<8x384xf32> -> vector<8x384xf32>
    %28 = arith.addf %22, %27 : vector<8x384xf32>
    %c0_27 = arith.constant 0 : index
    %c0_28 = arith.constant 0 : index
    %c20 = arith.constant 20 : index
    %29 = vector.load %arg2[%c0_27, %c0_28, %c20] : memref<1x4x512xbf16, #tpu.memory_space<vmem>>, vector<1x4x384xbf16>
    %30 = vector.shape_cast %29 : vector<1x4x384xbf16> to vector<4x384xbf16>
    %c5 = arith.constant 5 : index
    %c0_29 = arith.constant 0 : index
    %c0_30 = arith.constant 0 : index
    %31 = vector.load %arg3[%c5, %c0_29, %c0_30] : memref<9x8x4xbf16, #tpu.memory_space<vmem>>, vector<1x8x4xbf16>
    %32 = vector.shape_cast %31 : vector<1x8x4xbf16> to vector<8x4xbf16>
    %cst_31 = arith.constant dense<0.000000e+00> : vector<8x384xf32>
    %33 = tpu.matmul %32, %30, %cst_31 {dimension_numbers = #tpu.dot_dimension_numbers<[1], [0], [0], [1], [0, 0, 1, 1], [], []>} : vector<8x4xbf16>, vector<4x384xbf16>, vector<8x384xf32> -> vector<8x384xf32>
    %34 = arith.addf %28, %33 : vector<8x384xf32>
    %c0_32 = arith.constant 0 : index
    %c0_33 = arith.constant 0 : index
    %c36 = arith.constant 36 : index
    %35 = vector.load %arg2[%c0_32, %c0_33, %c36] : memref<1x4x512xbf16, #tpu.memory_space<vmem>>, vector<1x4x384xbf16>
    %36 = vector.shape_cast %35 : vector<1x4x384xbf16> to vector<4x384xbf16>
    %c6 = arith.constant 6 : index
    %c0_34 = arith.constant 0 : index
    %c0_35 = arith.constant 0 : index
    %37 = vector.load %arg3[%c6, %c0_34, %c0_35] : memref<9x8x4xbf16, #tpu.memory_space<vmem>>, vector<1x8x4xbf16>
    %38 = vector.shape_cast %37 : vector<1x8x4xbf16> to vector<8x4xbf16>
    %cst_36 = arith.constant dense<0.000000e+00> : vector<8x384xf32>
    %39 = tpu.matmul %38, %36, %cst_36 {dimension_numbers = #tpu.dot_dimension_numbers<[1], [0], [0], [1], [0, 0, 1, 1], [], []>} : vector<8x4xbf16>, vector<4x384xbf16>, vector<8x384xf32> -> vector<8x384xf32>
    %40 = arith.addf %34, %39 : vector<8x384xf32>
    %c0_37 = arith.constant 0 : index
    %c0_38 = arith.constant 0 : index
    %c37 = arith.constant 37 : index
    %41 = vector.load %arg2[%c0_37, %c0_38, %c37] : memref<1x4x512xbf16, #tpu.memory_space<vmem>>, vector<1x4x384xbf16>
    %42 = vector.shape_cast %41 : vector<1x4x384xbf16> to vector<4x384xbf16>
    %c7 = arith.constant 7 : index
    %c0_39 = arith.constant 0 : index
    %c0_40 = arith.constant 0 : index
    %43 = vector.load %arg3[%c7, %c0_39, %c0_40] : memref<9x8x4xbf16, #tpu.memory_space<vmem>>, vector<1x8x4xbf16>
    %44 = vector.shape_cast %43 : vector<1x8x4xbf16> to vector<8x4xbf16>
    %cst_41 = arith.constant dense<0.000000e+00> : vector<8x384xf32>
    %45 = tpu.matmul %44, %42, %cst_41 {dimension_numbers = #tpu.dot_dimension_numbers<[1], [0], [0], [1], [0, 0, 1, 1], [], []>} : vector<8x4xbf16>, vector<4x384xbf16>, vector<8x384xf32> -> vector<8x384xf32>
    %46 = arith.addf %40, %45 : vector<8x384xf32>
    %c0_42 = arith.constant 0 : index
    %c0_43 = arith.constant 0 : index
    %c38 = arith.constant 38 : index
    %47 = vector.load %arg2[%c0_42, %c0_43, %c38] : memref<1x4x512xbf16, #tpu.memory_space<vmem>>, vector<1x4x384xbf16>
    %48 = vector.shape_cast %47 : vector<1x4x384xbf16> to vector<4x384xbf16>
    %c8 = arith.constant 8 : index
    %c0_44 = arith.constant 0 : index
    %c0_45 = arith.constant 0 : index
    %49 = vector.load %arg3[%c8, %c0_44, %c0_45] : memref<9x8x4xbf16, #tpu.memory_space<vmem>>, vector<1x8x4xbf16>
    %50 = vector.shape_cast %49 : vector<1x8x4xbf16> to vector<8x4xbf16>
    %cst_46 = arith.constant dense<0.000000e+00> : vector<8x384xf32>
    %51 = tpu.matmul %50, %48, %cst_46 {dimension_numbers = #tpu.dot_dimension_numbers<[1], [0], [0], [1], [0, 0, 1, 1], [], []>} : vector<8x4xbf16>, vector<4x384xbf16>, vector<8x384xf32> -> vector<8x384xf32>
    %52 = arith.addf %46, %51 : vector<8x384xf32>
    %c0_47 = arith.constant 0 : index
    %c0_48 = arith.constant 0 : index
    %c0_49 = arith.constant 0 : index
    %53 = vector.load %arg4[%c0_47, %c0_48, %c0_49] : memref<1x8x384xf32, #tpu.memory_space<vmem>>, vector<1x8x384xf32>
    %54 = vector.shape_cast %53 : vector<1x8x384xf32> to vector<8x384xf32>
    %55 = vector.shape_cast %52 : vector<8x384xf32> to vector<1x8x384xf32>
    tpu.vector_store %arg4[%c0_47, %c0_48, %c0_49], %55 {strides = array<i32>} : memref<1x8x384xf32, #tpu.memory_space<vmem>>, vector<1x8x384xf32>,
    return
  }
  func.func @transform_0(%arg0: i32, %arg1: i32) -> (i32, i32, i32) {
    %c0_i32 = arith.constant 0 : i32
    %c0_i32_0 = arith.constant 0 : i32
    %c0_i32_1 = arith.constant 0 : i32
    return %arg0, %c0_i32, %c0_i32_0 : i32, i32, i32
  }
  func.func @transform_1(%arg0: i32, %arg1: i32) -> (i32, i32, i32) {
    %c0_i32 = arith.constant 0 : i32
    %c0_i32_0 = arith.constant 0 : i32
    %c0_i32_1 = arith.constant 0 : i32
    %c0_i32_2 = arith.constant 0 : i32
    return %c0_i32, %c0_i32_0, %c0_i32_1 : i32, i32, i32
  }
  func.func @transform_2(%arg0: i32, %arg1: i32) -> (i32, i32, i32) {
    %c0_i32 = arith.constant 0 : i32
    %c0_i32_0 = arith.constant 0 : i32
    return %arg0, %c0_i32, %arg1 : i32, i32, i32
  }
}

</mosaic_0001>

<bundles_post_ra>
// kernel: tpu_custom_call.1
= control target key start
LH: loop header
LB: loop body
LE: loop exit
PB: predicated region body
PF: predicated region fallthrough
CT: control target
= control target key end

     0   :  { %7 = vsyncpa [#allocation3], 0  ;;  %s1914_s0 = inlined_call_operand.vmem [shape: bf16[2,4,512], index: 0, kind: input, shape index: {}]   ;;  %s1915_s1 = inlined_call_operand.vmem [shape: bf16[9,8,4], index: 1, kind: input, shape index: {}]   ;;  %s1916_s2 = inlined_call_operand.hbm [shape: f32[2,8,384], index: 2, kind: output, shape index: {}]  }
   0x1   :  { %9 = vsyncpa [#allocation3 + $0x1], 0  ;;  %s1686_s9 = smov 0   ;;  %s1688_s10 = smov 0  }
   0x2   :  { %s1690_s11 = smov 0   ;;  %s1692_s12 = smov 0  }
   0x3   :  { %s1694_s13 = smov 0   ;;  %s1696_s14 = smov 0  }
   0x4 LB: > { %s1391_s15 = sadd.s32 4294967295, %s1656_s14   ;;  %s1392_s16 = sadd.s32 4294967294, %s1656_s14   ;;  %s1656_s14 = sphi %s1696_s14, %s15_s14   ;;  %s1652_s13 = sphi %s1694_s13, %s1923_s13   ;;  %s1648_s12 = sphi %s1692_s12, %s1922_s12   ;;  %s1644_s11 = sphi %s1690_s11, %s1921_s11   ;;  %s1640_s10 = sphi %s1688_s10, %s1920_s10   ;;  %s1636_s9 = sphi %s1686_s9, %s1919_s9  }
   0x5   : > { %s27_s17 = sadd.s32 1, %s1652_s13  ;;  %s83_s18 = sadd.s32 1, %s1644_s11 }
   0x6   : > { %p29_p0 = scmp.ge.s32.totalorder %s27_s17, 2  ;;  %p93_p1 = scmp.ne.s32.totalorder %s1644_s11, %s1640_s10 }
   0x7   : > { %p94_p2 = scmp.eq.s32.totalorder %s1391_s15, 1  ;;  %p99_p3 = scmp.ne.s32.totalorder %s1640_s10, %s1636_s9 }
   0x8   : > { %s1925_s17 = smov (%p29_p0, %s27_s17), 0  ;;  %p100_p5 = scmp.eq.s32.totalorder %s1392_s16, 1 }
   0x9   : > { %p1726_p4 = por %p94_p2, %p93_p1  ;;  %s78_s20 = ssub.s32 %s1652_s13, %s1925_s17 }
   0xa   : > { %p1395_p6 = scmp.ge.s32.totalorder %s1656_s14, 1  ;;  %p81_p7 = scmp.eq.s32.totalorder %s78_s20, 0 }
   0xb   : > { %p1733_p8 = por %p100_p5, %p99_p3  ;;  %p129_p9 = scmp.lt.s32.totalorder %s1656_s14, 3 }
   0xc   : > { %s1739_s22 = scalar_select %p81_p7, %s1644_s11, %s83_s18  }
   0xd   : > { %p130_p10 = pnand %p1395_p6, %p129_p9 }
   0xe   : > { %p151_p11 = scmp.lt.s32.totalorder (!%p130_p10), %s1648_s12, 1  ;;  %s1662_s28 = smov (!%p130_p10), 127  }
   0xf   : > { %133 = sbr.rel (%p130_p10) target bundleno = 428 (0x1ac), region = 28  ;;  %s1663_s29 = smov (!%p130_p10), 126  }
  0x10   : > { %s1664_s30 = smov (!%p130_p10), 110   ;;  %s1665_s3 = smov (!%p130_p10), 109  }
  0x11   : > { %s1666_s4 = smov (!%p130_p10), 108   ;;  %s1667_s5 = smov (!%p130_p10), 92  }
  0x12   : > { %s1668_s6 = smov (!%p130_p10), 91   ;;  %s1669_s7 = smov (!%p130_p10), 90  }
  0x13   : > { %s148_s8 = sand.u32 (!%p130_p10), 1, %s1640_s10   ;;  %s1510_s16 = smul.u32 (!%p130_p10), 384, %s1648_s12 }
  0x14   : > { %v168_v0 = vlaneseq  ;;  %v1658_v1 = vmov 1983009808   ;;  %s152_s23 = scalar_select %p151_p11, %s1648_s12, 1  ;;  %v1659_v5 = vmov 0.0   ;;  %v1660_v6 = vmov 0  }
  0x15   : > { %v166_v2 = vunpack.c.l.s4 %v1658_v1  ;;  %1455 = vmatprep.subr.bf16.mxu1 %v1659_v5  ;;  %239 = vmatprep.mubr.bf16.mxu0 %v1660_v6  ;;  %vm1661_vm0 = vmmov 0   ;;  %vm189_vm1 = vcmask 1039360   ;;  %vm197_vm2 = vcmask 1041408   ;;  %v1398_v27 = vld [vmem:[%s1915_s1 + $0x4] sm:$0xf]  ;;  %s1509_s15 = smul.u32 24, %s148_s8  ;;  %s1866_s25 = scalar_lea.hbm %s1916_s2, %s1510_s16 }
  0x16   : > { %v169_v3 = vshrl.u32 %v168_v0, 7  ;;  %s1436_s24 = sshll.u32 %s152_s23, 3  ;;  %1457 = vmatprep.mubr.msk.bf16.mxu1 %vm1661_vm0, %v1659_v5  ;;  %vm193_vm3 = vcmask 31744   ;;  %vm427_vm4 = vcmask 1031168   ;;  %v159_v38 = vld [vmem:[%s1915_s1] sm:$0xf] }
  0x17   : > { %v167_v4 = vunpack.c.0.s8 %v166_v2  ;;  %s155_s27 = scalar_lea.vmem %s1914_s0, %s1436_s24  ;;  %vm556_vm5 = vcmask 900096   ;;  %v1405_v48 = vld [vmem:[%s1915_s1 + $0x8] sm:$0xf]  ;;  %vm685_vm6 = vcmask 891904   ;;  %v1409_v58 = vld [vmem:[%s1915_s1 + $0xc] sm:$0xf] }
  0x18   : > { %v160_v8 = vld [vmem:[%s155_s27] sm:$0xff]  ;;  %vm814_vm7 = vcmask 883712   ;;  %vm943_vm8 = vcmask 752640   ;;  %vm1072_vm9 = vcmask 744448   ;;  %vm1201_vm10 = vcmask 736256   ;;  %s150_s18 = scalar_lea.vmem [#allocation2], %s1509_s15 }
  0x19   : > { %v170_v7 = vsub.s32 %v167_v4, %v169_v3  ;;  %v158_v9 = vld [vmem:[%s155_s27] sm:$0x3f]  ;;  %v164_v11 = vcombine.high %v160_v8, %v160_v8  ;;  %v1413_v4 = vld [vmem:[%s1915_s1 + $0x10] sm:$0xf]  ;;  %s1321_s20 = sshll.u32 %s150_s18, 4  ;;  %s1305_s12 = scalar_lea.sflag [#allocation3], %s148_s8  ;;  %s1868_s20 = int_to_ptr.vmem [resolvable:$true] %s1321_s20 }
  0x1a   : > { %v289_v13 = vcombine.high %v158_v9, %v158_v9  ;;  %s1580_s26 = scalar_lea.vmem %s1868_s20, 384  ;;  %s1670_s27 = smov [#allocation2]  }
  0x1b   : > { %v171_v10 = vrot.slane %v160_v8, %v170_v7  ;;  %v1750_v12 = vrot.slane %v158_v9, %v170_v7  ;;  %v178_v15 = vrot.slane %v164_v11, %v170_v7  ;;  %p1581_p12 = scmp.ne.s32.totalorder %s1868_s20, %s1580_s26 }
  0x1c   : > { %v303_v16 = vrot.slane %v289_v13, %v170_v7 }
  0x1d   : > { %181 = vrot.lane.b32.xlu0 %v171_v10, %s1662_s28  ;;  %v179_v14 = vcombine.high %v171_v10, %v171_v10  ;;  %185 = vrot.lane.b32.xlu1 %v178_v15, %s1662_s28  ;;  %v180_v17 = vcombine.high %v178_v15, %v178_v15  ;;  %v304_v21 = vcombine.high %v1750_v12, %v1750_v12  ;;  %v309_v30 = vsel %vm197_vm2, %v1750_v12, 0  ;;  %p1582_p13 = pnand %p1581_p12, %p1726_p4 }
  0x1e   : > { %v315_v31 = vsel %vm197_vm2, %v303_v16, 0  ;;  %v1417_v16 = vld [vmem:[%s1915_s1 + $0x14] sm:$0xf] }
  0x1f   : > { %p1583_p0 = pneg %p1582_p13 }
  0x21   : > { %183 = vrot.lane.b32.xlu0 %v179_v14, %s1662_s28  ;;  %187 = vrot.lane.b32.xlu1 %v180_v17, %s1662_s28  ;;  %s1584_s28 = sshll.u32 %s1670_s27, 4  ;;  %s1585_s28 = int_to_ptr.vmem [resolvable:$false] %s1584_s28 }
  0x22   : > { %p1587_p1 = scmp.lt.s32.totalorder %s1868_s20, %s1585_s28 }
  0x25   : > { %419 = vrot.lane.b32.xlu0 %v171_v10, %s1663_s29  ;;  %421 = vrot.lane.b32.xlu1 %v179_v14, %s1663_s29 }
  0x29   : > { %423 = vrot.lane.b32.xlu0 %v178_v15, %s1663_s29  ;;  %425 = vrot.lane.b32.xlu1 %v180_v17, %s1663_s29  ;;  %s1586_s29 = scalar_lea.vmem %s1585_s28, 768 }
  0x2a   : > { %p1588_p2 = scmp.lt.s32.totalorder %s1586_s29, %s1580_s26 }
  0x2c   : > { %p1589_p3 = por %p1588_p2, %p1587_p1 }
  0x2d   : > { %548 = vrot.lane.b32.xlu0 %v171_v10, %s1664_s30  ;;  %550 = vrot.lane.b32.xlu1 %v179_v14, %s1664_s30 }
  0x2e   : > { %p1590_p5 = pnand %p1589_p3, %p1583_p0 }
  0x31   : > { %552 = vrot.lane.b32.xlu0 %v178_v15, %s1664_s30  ;;  %554 = vrot.lane.b32.xlu1 %v180_v17, %s1664_s30 }
  0x35   : > { %677 = vrot.lane.b32.xlu0 %v171_v10, %s1665_s3  ;;  %679 = vrot.lane.b32.xlu1 %v179_v14, %s1665_s3 }
  0x39   : > { %681 = vrot.lane.b32.xlu0 %v178_v15, %s1665_s3  ;;  %683 = vrot.lane.b32.xlu1 %v180_v17, %s1665_s3 }
  0x3d   : > { %806 = vrot.lane.b32.xlu0 %v171_v10, %s1666_s4  ;;  %808 = vrot.lane.b32.xlu1 %v179_v14, %s1666_s4 }
  0x41   : > { %810 = vrot.lane.b32.xlu0 %v178_v15, %s1666_s4  ;;  %812 = vrot.lane.b32.xlu1 %v180_v17, %s1666_s4 }
  0x45   : > { %935 = vrot.lane.b32.xlu0 %v171_v10, %s1667_s5  ;;  %937 = vrot.lane.b32.xlu1 %v179_v14, %s1667_s5 }
  0x49   : > { %939 = vrot.lane.b32.xlu0 %v178_v15, %s1667_s5  ;;  %941 = vrot.lane.b32.xlu1 %v180_v17, %s1667_s5 }
  0x4d   : > { %1064 = vrot.lane.b32.xlu0 %v171_v10, %s1668_s6  ;;  %1066 = vrot.lane.b32.xlu1 %v179_v14, %s1668_s6 }
  0x51   : > { %1068 = vrot.lane.b32.xlu0 %v178_v15, %s1668_s6  ;;  %1070 = vrot.lane.b32.xlu1 %v180_v17, %s1668_s6 }
  0x55   : > { %1193 = vrot.lane.b32.xlu0 %v171_v10, %s1669_s7  ;;  %1195 = vrot.lane.b32.xlu1 %v179_v14, %s1669_s7 }
  0x59   : > { %1197 = vrot.lane.b32.xlu0 %v178_v15, %s1669_s7  ;;  %1199 = vrot.lane.b32.xlu1 %v180_v17, %s1669_s7 }
  0x8f   : > { %v182_v18 = vpop.permute.xlu0 %181  ;;  %v186_v19 = vpop.permute.xlu1 %185 }
  0x93   : > { %v184_v20 = vpop.permute.xlu0 %183  ;;  %v188_v24 = vpop.permute.xlu1 %187 }
  0x94   : > { %v191_v22 = vsel %vm189_vm1, %v184_v20, %v186_v19  ;;  %v190_v23 = vsel %vm189_vm1, %v182_v18, %v184_v20  ;;  %v192_v26 = vsel %vm189_vm1, %v186_v19, %v188_v24 }
  0x95   : > { %1399 = vmatprep.subr.msk.bf16.mxu0 %vm197_vm2, %v191_v22  ;;  %v199_v25 = vsel %vm197_vm2, %v190_v23, 0  ;;  %v205_v28 = vsel %vm197_vm2, %v192_v26, 0  ;;  %v1421_v26 = vld [vmem:[%s1915_s1 + $0x18] sm:$0xf] }
  0x96   : > { %222 = vmatpush1.bf16.msra.mxu0 %v199_v25  ;;  %1456 = vmatpush3.bf16.msra.mxu1 %v205_v28 }
  0x97   : > { %v420_v29 = vpop.permute.xlu0 %419  ;;  %1402 = vmatprep.subr.msk.bf16.mxu0 %vm197_vm2, %v304_v21  ;;  %1461 = vmatprep.subr.bf16.mxu1 %v1659_v5  ;;  %v422_v32 = vpop.permute.xlu1 %421 }
  0x98   : > { %v428_v34 = vsel %vm427_vm4, %v420_v29, %v422_v32 }
  0x99   : > { %1400 = vmatmul.mubr.msk.bf16.vlgmr.msra.gmra.mxu0 %vm193_vm3, %v1398_v27  ;;  %1458 = vmatmul.mubr.msk.bf16.vlgmr.msra.gmra.mxu1 %vm193_vm3, %v1398_v27  ;;  %v435_v39 = vsel %vm197_vm2, %v428_v34, 0 }
  0x9a   : > { %332 = vmatpush1.bf16.msra.mxu0 %v309_v30  ;;  %349 = vmatprep.mubr.bf16.mxu0 %v1660_v6 }
  0x9b   : > { %v424_v33 = vpop.permute.xlu0 %423  ;;  %1462 = vmatpush3.bf16.msra.mxu1 %v315_v31  ;;  %1463 = vmatprep.mubr.msk.bf16.mxu1 %vm1661_vm0, %v1659_v5  ;;  %v426_v36 = vpop.permute.xlu1 %425 }
  0x9c   : > { %v429_v35 = vsel %vm427_vm4, %v422_v32, %v424_v33  ;;  %1467 = vmatprep.subr.bf16.mxu1 %v1659_v5  ;;  %v430_v37 = vsel %vm427_vm4, %v424_v33, %v426_v36  ;;  %v1425_v36 = vld [vmem:[%s1915_s1 + $0x1c] sm:$0xf] }
  0x9d   : > { %1406 = vmatprep.subr.msk.bf16.mxu0 %vm197_vm2, %v429_v35  ;;  %v441_v41 = vsel %vm197_vm2, %v430_v37, 0 }
  0x9f   : > { %v549_v40 = vpop.permute.xlu0 %548  ;;  %v551_v42 = vpop.permute.xlu1 %550 }
  0xa0   : > { %v557_v44 = vsel %vm556_vm5, %v549_v40, %v551_v42 }
  0xa1   : > { %1403 = vmatmul.mubr.msk.bf16.vlgmr.msra.gmra.mxu0 %vm193_vm3, %v159_v38  ;;  %1464 = vmatmul.mubr.msk.bf16.vlgmr.msra.gmra.mxu1 %vm193_vm3, %v159_v38  ;;  %v564_v49 = vsel %vm197_vm2, %v557_v44, 0 }
  0xa2   : > { %458 = vmatpush1.bf16.msra.mxu0 %v435_v39  ;;  %475 = vmatprep.mubr.bf16.mxu0 %v1660_v6  ;;  %v1429_v39 = vld [vmem:[%s1915_s1 + $0x20] sm:$0xf] }
  0xa3   : > { %v553_v43 = vpop.permute.xlu0 %552  ;;  %1468 = vmatpush3.bf16.msra.mxu1 %v441_v41  ;;  %1469 = vmatprep.mubr.msk.bf16.mxu1 %vm1661_vm0, %v1659_v5  ;;  %v555_v46 = vpop.permute.xlu1 %554 }
  0xa4   : > { %v558_v45 = vsel %vm556_vm5, %v551_v42, %v553_v43  ;;  %1473 = vmatprep.subr.bf16.mxu1 %v1659_v5  ;;  %v559_v47 = vsel %vm556_vm5, %v553_v43, %v555_v46 }
  0xa5   : > { %1410 = vmatprep.subr.msk.bf16.mxu0 %vm197_vm2, %v558_v45  ;;  %v570_v51 = vsel %vm197_vm2, %v559_v47, 0 }
  0xa7   : > { %v678_v50 = vpop.permute.xlu0 %677  ;;  %v680_v52 = vpop.permute.xlu1 %679 }
  0xa8   : > { %v686_v54 = vsel %vm685_vm6, %v678_v50, %v680_v52 }
  0xa9   : > { %1407 = vmatmul.mubr.msk.bf16.vlgmr.msra.gmra.mxu0 %vm193_vm3, %v1405_v48  ;;  %1470 = vmatmul.mubr.msk.bf16.vlgmr.msra.gmra.mxu1 %vm193_vm3, %v1405_v48  ;;  %v693_v59 = vsel %vm197_vm2, %v686_v54, 0 }
  0xaa   : > { %587 = vmatpush1.bf16.msra.mxu0 %v564_v49  ;;  %604 = vmatprep.mubr.bf16.mxu0 %v1660_v6 }
  0xab   : > { %v682_v53 = vpop.permute.xlu0 %681  ;;  %1474 = vmatpush3.bf16.msra.mxu1 %v570_v51  ;;  %1475 = vmatprep.mubr.msk.bf16.mxu1 %vm1661_vm0, %v1659_v5  ;;  %v684_v56 = vpop.permute.xlu1 %683 }
  0xac   : > { %v687_v55 = vsel %vm685_vm6, %v680_v52, %v682_v53  ;;  %1479 = vmatprep.subr.bf16.mxu1 %v1659_v5  ;;  %v688_v57 = vsel %vm685_vm6, %v682_v53, %v684_v56 }
  0xad   : > { %1414 = vmatprep.subr.msk.bf16.mxu0 %vm197_vm2, %v687_v55  ;;  %v699_v61 = vsel %vm197_vm2, %v688_v57, 0 }
  0xaf   : > { %v807_v60 = vpop.permute.xlu0 %806  ;;  %v809_v62 = vpop.permute.xlu1 %808 }
  0xb0   : > { %v815_v0 = vsel %vm814_vm7, %v807_v60, %v809_v62 }
  0xb1   : > { %1411 = vmatmul.mubr.msk.bf16.vlgmr.msra.gmra.mxu0 %vm193_vm3, %v1409_v58  ;;  %1476 = vmatmul.mubr.msk.bf16.vlgmr.msra.gmra.mxu1 %vm193_vm3, %v1409_v58  ;;  %v822_v7 = vsel %vm197_vm2, %v815_v0, 0 }
  0xb2   : > { %716 = vmatpush1.bf16.msra.mxu0 %v693_v59  ;;  %733 = vmatprep.mubr.bf16.mxu0 %v1660_v6 }
  0xb3   : > { %v811_v63 = vpop.permute.xlu0 %810  ;;  %1480 = vmatpush3.bf16.msra.mxu1 %v699_v61  ;;  %1481 = vmatprep.mubr.msk.bf16.mxu1 %vm1661_vm0, %v1659_v5  ;;  %v813_v2 = vpop.permute.xlu1 %812 }
  0xb4   : > { %v816_v1 = vsel %vm814_vm7, %v809_v62, %v811_v63  ;;  %1485 = vmatprep.subr.bf16.mxu1 %v1659_v5  ;;  %v817_v3 = vsel %vm814_vm7, %v811_v63, %v813_v2 }
  0xb5   : > { %1418 = vmatprep.subr.msk.bf16.mxu0 %vm197_vm2, %v816_v1  ;;  %v828_v9 = vsel %vm197_vm2, %v817_v3, 0 }
  0xb7   : > { %v936_v8 = vpop.permute.xlu0 %935  ;;  %v938_v10 = vpop.permute.xlu1 %937 }
  0xb8   : > { %v944_v12 = vsel %vm943_vm8, %v936_v8, %v938_v10 }
  0xb9   : > { %1415 = vmatmul.mubr.msk.bf16.vlgmr.msra.gmra.mxu0 %vm193_vm3, %v1413_v4  ;;  %1482 = vmatmul.mubr.msk.bf16.vlgmr.msra.gmra.mxu1 %vm193_vm3, %v1413_v4  ;;  %v951_v17 = vsel %vm197_vm2, %v944_v12, 0 }
  0xba   : > { %845 = vmatpush1.bf16.msra.mxu0 %v822_v7  ;;  %862 = vmatprep.mubr.bf16.mxu0 %v1660_v6 }
  0xbb   : > { %v940_v11 = vpop.permute.xlu0 %939  ;;  %1486 = vmatpush3.bf16.msra.mxu1 %v828_v9  ;;  %1487 = vmatprep.mubr.msk.bf16.mxu1 %vm1661_vm0, %v1659_v5  ;;  %v942_v14 = vpop.permute.xlu1 %941 }
  0xbc   : > { %v945_v13 = vsel %vm943_vm8, %v938_v10, %v940_v11  ;;  %1491 = vmatprep.subr.bf16.mxu1 %v1659_v5  ;;  %v946_v15 = vsel %vm943_vm8, %v940_v11, %v942_v14 }
  0xbd   : > { %1422 = vmatprep.subr.msk.bf16.mxu0 %vm197_vm2, %v945_v13  ;;  %v957_v19 = vsel %vm197_vm2, %v946_v15, 0 }
  0xbf   : > { %v1065_v18 = vpop.permute.xlu0 %1064  ;;  %v1067_v20 = vpop.permute.xlu1 %1066 }
  0xc0   : > { %v1073_v22 = vsel %vm1072_vm9, %v1065_v18, %v1067_v20 }
  0xc1   : > { %1419 = vmatmul.mubr.msk.bf16.vlgmr.msra.gmra.mxu0 %vm193_vm3, %v1417_v16  ;;  %1488 = vmatmul.mubr.msk.bf16.vlgmr.msra.gmra.mxu1 %vm193_vm3, %v1417_v16  ;;  %v1080_v27 = vsel %vm197_vm2, %v1073_v22, 0 }
  0xc2   : > { %974 = vmatpush1.bf16.msra.mxu0 %v951_v17  ;;  %991 = vmatprep.mubr.bf16.mxu0 %v1660_v6 }
  0xc3   : > { %v1069_v21 = vpop.permute.xlu0 %1068  ;;  %1492 = vmatpush3.bf16.msra.mxu1 %v957_v19  ;;  %1493 = vmatprep.mubr.msk.bf16.mxu1 %vm1661_vm0, %v1659_v5  ;;  %v1071_v24 = vpop.permute.xlu1 %1070 }
  0xc4   : > { %v1074_v23 = vsel %vm1072_vm9, %v1067_v20, %v1069_v21  ;;  %1497 = vmatprep.subr.bf16.mxu1 %v1659_v5  ;;  %v1075_v25 = vsel %vm1072_vm9, %v1069_v21, %v1071_v24 }
  0xc5   : > { %1426 = vmatprep.subr.msk.bf16.mxu0 %vm197_vm2, %v1074_v23  ;;  %v1086_v29 = vsel %vm197_vm2, %v1075_v25, 0 }
  0xc7   : > { %v1194_v28 = vpop.permute.xlu0 %1193  ;;  %v1196_v30 = vpop.permute.xlu1 %1195 }
  0xc8   : > { %v1202_v32 = vsel %vm1201_vm10, %v1194_v28, %v1196_v30 }
  0xc9   : > { %1423 = vmatmul.mubr.msk.bf16.vlgmr.msra.gmra.mxu0 %vm193_vm3, %v1421_v26  ;;  %1494 = vmatmul.mubr.msk.bf16.vlgmr.msra.gmra.mxu1 %vm193_vm3, %v1421_v26  ;;  %v1209_v37 = vsel %vm197_vm2, %v1202_v32, 0 }
  0xca   : > { %1103 = vmatpush1.bf16.msra.mxu0 %v1080_v27  ;;  %1120 = vmatprep.mubr.bf16.mxu0 %v1660_v6 }
  0xcb   : > { %v1198_v31 = vpop.permute.xlu0 %1197  ;;  %1498 = vmatpush3.bf16.msra.mxu1 %v1086_v29  ;;  %1499 = vmatprep.mubr.msk.bf16.mxu1 %vm1661_vm0, %v1659_v5  ;;  %v1200_v34 = vpop.permute.xlu1 %1199 }
  0xcc   : > { %v1203_v33 = vsel %vm1201_vm10, %v1196_v30, %v1198_v31  ;;  %1503 = vmatprep.subr.bf16.mxu1 %v1659_v5  ;;  %v1204_v35 = vsel %vm1201_vm10, %v1198_v31, %v1200_v34 }
  0xcd   : > { %1430 = vmatprep.subr.msk.bf16.mxu0 %vm197_vm2, %v1203_v33  ;;  %v1215_v38 = vsel %vm197_vm2, %v1204_v35, 0 }
  0xd1   : > { %1427 = vmatmul.mubr.msk.bf16.vlgmr.msra.gmra.mxu0 %vm193_vm3, %v1425_v36  ;;  %1500 = vmatmul.mubr.msk.bf16.vlgmr.msra.gmra.mxu1 %vm193_vm3, %v1425_v36 }
  0xd2   : > { %1232 = vmatpush1.bf16.msra.mxu0 %v1209_v37  ;;  %1249 = vmatprep.mubr.bf16.mxu0 %v1660_v6 }
  0xd3   : > { %1504 = vmatpush3.bf16.msra.mxu1 %v1215_v38  ;;  %1505 = vmatprep.mubr.msk.bf16.mxu1 %vm1661_vm0, %v1659_v5 }
  0xd9   : > { %1431 = vmatmul.mubr.msk.bf16.vlgmr.msra.gmra.mxu0 %vm193_vm3, %v1429_v39  ;;  %1506 = vmatmul.mubr.msk.bf16.vlgmr.msra.gmra.mxu1 %vm193_vm3, %v1429_v39 }
 0x159   : > { %v241_v40 = vpop.f32.mrf.mxu0  ;;  %v282_v42 = vpop.f32.mrf.mxu1 }
 0x15b   : > { %v243_v41 = vpop.f32.mrf.mxu0  ;;  %v1459_v44 = vpop.f32.mrf.mxu1 }
 0x15d   : > { %v245_v43 = vpop.f32.mrf.mxu0  ;;  %v285_v45 = vpop.f32.mrf.mxu1 }
 0x15f   : > { %v246_v6 = vpop.f32.mrf.mxu0  ;;  %v1460_v46 = vpop.f32.mrf.mxu1 }
 0x161   : > { %v351_v47 = vpop.f32.mrf.mxu0  ;;  %v392_v49 = vpop.f32.mrf.mxu1 }
 0x162   : > { %v352_v27 = vadd.f32 %v351_v47, %v241_v40  ;;  %v393_v31 = vadd.f32 %v392_v49, %v282_v42 }
 0x163   : > { %v353_v48 = vpop.f32.mrf.mxu0  ;;  %v1465_v50 = vpop.f32.mrf.mxu1 }
 0x164   : > { %v354_v30 = vadd.f32 %v353_v48, %v243_v41 }
 0x165   : > { %v355_v5 = vpop.f32.mrf.mxu0  ;;  %v395_v52 = vpop.f32.mrf.mxu1 }
 0x167   : > { %v356_v51 = vpop.f32.mrf.mxu0  ;;  %v1466_v53 = vpop.f32.mrf.mxu1 }
 0x169   : > { %v477_v54 = vpop.f32.mrf.mxu0  ;;  %v518_v56 = vpop.f32.mrf.mxu1 }
 0x16a   : > { %v524_v32 = vadd.f32 %v477_v54, %v352_v27  ;;  %v526_v36 = vadd.f32 %v518_v56, %v393_v31 }
 0x16b   : > { %v479_v55 = vpop.f32.mrf.mxu0  ;;  %v1471_v58 = vpop.f32.mrf.mxu1 }
 0x16c   : > { %v525_v35 = vadd.f32 %v479_v55, %v354_v30 }
 0x16d   : > { %v481_v57 = vpop.f32.mrf.mxu0  ;;  %v521_v60 = vpop.f32.mrf.mxu1 }
 0x16f   : > { %v482_v59 = vpop.f32.mrf.mxu0  ;;  %v1472_v61 = vpop.f32.mrf.mxu1 }
 0x171   : > { %v606_v62 = vpop.f32.mrf.mxu0  ;;  %v647_v0 = vpop.f32.mrf.mxu1 }
 0x172   : > { %v653_v37 = vadd.f32 %v606_v62, %v524_v32  ;;  %v655_v44 = vadd.f32 %v647_v0, %v526_v36 }
 0x173   : > { %v608_v63 = vpop.f32.mrf.mxu0  ;;  %v1477_v2 = vpop.f32.mrf.mxu1 }
 0x174   : > { %v654_v43 = vadd.f32 %v608_v63, %v525_v35 }
 0x175   : > { %v610_v1 = vpop.f32.mrf.mxu0  ;;  %v650_v4 = vpop.f32.mrf.mxu1 }
 0x177   : > { %v611_v3 = vpop.f32.mrf.mxu0  ;;  %v1478_v7 = vpop.f32.mrf.mxu1 }
 0x179   : > { %v735_v8 = vpop.f32.mrf.mxu0  ;;  %v776_v10 = vpop.f32.mrf.mxu1 }
 0x17a   : > { %v782_v6 = vadd.f32 %v735_v8, %v653_v37  ;;  %v784_v47 = vadd.f32 %v776_v10, %v655_v44 }
 0x17b   : > { %v737_v9 = vpop.f32.mrf.mxu0  ;;  %v1483_v12 = vpop.f32.mrf.mxu1 }
 0x17c   : > { %v783_v46 = vadd.f32 %v737_v9, %v654_v43 }
 0x17d   : > { %v739_v11 = vpop.f32.mrf.mxu0  ;;  %v779_v14 = vpop.f32.mrf.mxu1 }
 0x17f   : > { %v740_v13 = vpop.f32.mrf.mxu0  ;;  %v1484_v15 = vpop.f32.mrf.mxu1 }
 0x181   : > { %v864_v16 = vpop.f32.mrf.mxu0  ;;  %v905_v18 = vpop.f32.mrf.mxu1 }
 0x182   : > { %v911_v41 = vadd.f32 %v864_v16, %v782_v6  ;;  %v913_v5 = vadd.f32 %v905_v18, %v784_v47 }
 0x183   : > { %v866_v17 = vpop.f32.mrf.mxu0  ;;  %v1489_v20 = vpop.f32.mrf.mxu1 }
 0x184   : > { %v912_v49 = vadd.f32 %v866_v17, %v783_v46 }
 0x185   : > { %v868_v19 = vpop.f32.mrf.mxu0  ;;  %v908_v22 = vpop.f32.mrf.mxu1 }
 0x187   : > { %v869_v21 = vpop.f32.mrf.mxu0  ;;  %v1490_v23 = vpop.f32.mrf.mxu1 }
 0x189   : > { %v993_v24 = vpop.f32.mrf.mxu0  ;;  %v1034_v26 = vpop.f32.mrf.mxu1 }
 0x18a   : > { %v1040_v50 = vadd.f32 %v993_v24, %v911_v41  ;;  %v1042_v54 = vadd.f32 %v1034_v26, %v913_v5 }
 0x18b   : > { %v995_v25 = vpop.f32.mrf.mxu0  ;;  %v1495_v29 = vpop.f32.mrf.mxu1 }
 0x18c   : > { %v1041_v53 = vadd.f32 %v995_v25, %v912_v49 }
 0x18d   : > { %v997_v28 = vpop.f32.mrf.mxu0  ;;  %v1037_v34 = vpop.f32.mrf.mxu1 }
 0x18f   : > { %v998_v33 = vpop.f32.mrf.mxu0  ;;  %v1496_v38 = vpop.f32.mrf.mxu1 }
 0x191   : > { %v1122_v39 = vpop.f32.mrf.mxu0  ;;  %v1163_v40 = vpop.f32.mrf.mxu1 }
 0x192   : > { %v1169_v55 = vadd.f32 %v1122_v39, %v1040_v50  ;;  %v1171_v59 = vadd.f32 %v1163_v40, %v1042_v54 }
 0x193   : > { %v1124_v45 = vpop.f32.mrf.mxu0  ;;  %v1501_v48 = vpop.f32.mrf.mxu1 }
 0x194   : > { %v1170_v58 = vadd.f32 %v1124_v45, %v1041_v53 }
 0x195   : > { %v1126_v42 = vpop.f32.mrf.mxu0  ;;  %v1166_v52 = vpop.f32.mrf.mxu1 }
 0x197   : > { %v1127_v51 = vpop.f32.mrf.mxu0  ;;  %v1502_v56 = vpop.f32.mrf.mxu1 }
 0x199   : > { %v1251_v57 = vpop.f32.mrf.mxu0  ;;  %v1292_v62 = vpop.f32.mrf.mxu1 }
 0x19a   : > { %v1298_v60 = vadd.f32 %v1251_v57, %v1169_v55  ;;  %v1300_v0 = vadd.f32 %v1292_v62, %v1171_v59 }
 0x19b   : > { %v1253_v61 = vpop.f32.mrf.mxu0  ;;  %v1507_v2 = vpop.f32.mrf.mxu1 }
 0x19c   : > { %1301 = vst [vmem:[%s150_s18] sm:$0xff] %v1298_v60  ;;  %v1299_v63 = vadd.f32 %v1253_v61, %v1170_v58  ;;  %1303 = vst [vmem:[%s150_s18 + $0x10] sm:$0xff] %v1300_v0 }
 0x19d   : > { %v1255_v1 = vpop.f32.mrf.mxu0  ;;  %v1295_v4 = vpop.f32.mrf.mxu1 }
 0x19e   : > { %1302 = vst [vmem:[%s150_s18 + $0x8] sm:$0xff] %v1299_v63 }
 0x19f   : > { %v1256_v3 = vpop.f32.mrf.mxu0 }
 0x1a0   : > { %1593 = shalt.err (!%p1590_p5)
}
 0x1a1   : > { %s1594_s30 = scalar_lea.hbm %s1866_s25, 384  ;;  %s1598_s5 = scalar_lea.hbm %s1916_s2, 768 }
 0x1a2   : > { %p1595_p6 = scmp.ne.s32.totalorder %s1866_s25, %s1594_s30  ;;  %p1599_p10 = scmp.lt.s32.totalorder %s1866_s25, %s1916_s2 }
 0x1a3   : > { %p1600_p11 = scmp.lt.s32.totalorder %s1598_s5, %s1594_s30 }
 0x1a4   : > { %p1596_p7 = pnand %p1595_p6, %p1726_p4 }
 0x1a5   : > { %p1601_p12 = por %p1600_p11, %p1599_p10 }
 0x1a6   : > { %p1597_p9 = pneg %p1596_p7 }
 0x1a8   : > { %p1602_p13 = pnand %p1601_p12, %p1597_p9 }
 0x1aa   : > { %1605 = shalt.err (!%p1602_p13)
}
 0x1ab   : > { %1511 = dma.vmem_to_hbm [thread:$0]  (%p1726_p4), %s1868_s20, 384, %s1866_s25, %s1305_s12   ;;  %v1508_v7 = vpop.f32.mrf.mxu1 }
 0x1ac PF: > { %p1517_p0 = scmp.ge.s32.totalorder %s1656_s14, 2  ;;  %s1333_s8 = sand.u32 1, %s1636_s9  }
 0x1ad   : > { %s1334_s15 = scalar_lea.sflag [#allocation3], %s1333_s8 }
 0x1ae   : > { %p1514_p1 = pnand %p1517_p0, %p1733_p8 }
 0x1b0   : > { %p1515_p2 = pneg %p1514_p1 }
 0x1b2   : > { %1631 = dma.done.wait (%p1515_p2), %s1334_s15, 384  }
 0x1b3   : > { %1633 = vsyncadd (%p1515_p2), %s1334_s15, 4294966912  ;;  %s15_s14 = sadd.s32 1, %s1656_s14   ;;  %s1919_s9 = smov %s1640_s10 }
 0x1b4   : > { %p12_p3 = scmp.ge.s32.totalorder %s15_s14, 4   ;;  %s1920_s10 = smov %s1644_s11 }
 0x1b5   : > { %s1921_s11 = smov %s1739_s22  ;;  %s1922_s12 = smov %s1652_s13 }
 0x1b6   : > { %s1923_s13 = smov %s1925_s17  ;;  %14 = sbr.rel (!%p12_p3) target bundleno = 4 (0x4), region = 71 }
 0x1bb   :  { %1339 = vsyncpa [#allocation3], 1 }
 0x1bc   :  { %1341 = vsyncpa [#allocation3 + $0x1], 1 }

</bundles_post_ra>
